<compile_context>
chip_gen: v6e
topology: v6e:2x2x1
jax: 0.10.0
libtpu: 0.0.40
codegen_flags: <defaults>
</compile_context>

<pallas_src>
import jax
import jax.numpy as jnp
from jax.experimental import pallas as pl
from jax.experimental.pallas import tpu as pltpu

EPS = 1e-5  # nn.InstanceNorm2d default eps


def _conv_phase_kernel(xa_ref, xh_ref, w_ref, y_ref, ssum_ref, ssq_ref):
    """Pass 1: phase-decomposed transposed conv + per-tile sum / sum-of-squares.

    xa_ref  : (1, TR, W+1, Cin)  bf16  input rows [t*TR, t*TR+TR) of the bottom/right
                                       zero-padded NHWC input
    xh_ref  : (1, 1,  W+1, Cin)  bf16  halo row t*TR+TR (next tile's first row / zero pad)
    w_ref   : (4*Cin, 4*Cout)    bf16  packed weights: row block q=2*dy+dx (neighbour quad),
                                       col block p=2*rp+cp (output parity phase)
    y_ref   : (1, TR*W, 4*Cout)  f32   raw conv output, phase-major channel layout
    ssum_ref: (1, 1, 1, 4*Cout)  f32   per-tile sum   (for InstanceNorm)
    ssq_ref : (1, 1, 1, 4*Cout)  f32   per-tile sumsq (for InstanceNorm)
    """
    TR = xa_ref.shape[1]
    Wp1 = xa_ref.shape[2]
    Cin = xa_ref.shape[3]
    W = Wp1 - 1

    xa = xa_ref[0]                                   # (TR,   W+1, Cin)
    xh = xh_ref[0]                                   # (1,    W+1, Cin)
    xf = jnp.concatenate([xa, xh], axis=0)           # (TR+1, W+1, Cin)

    # 2x2 neighbour-quad taps of the *undilated* input (zero pad supplies the edge taps).
    a00 = xf[0:TR,     0:W,     :]
    a01 = xf[0:TR,     1:W + 1, :]
    a10 = xf[1:TR + 1, 0:W,     :]
    a11 = xf[1:TR + 1, 1:W + 1, :]

    # K-packed patch: one (TR*W, 4*Cin) x (4*Cin, 4*Cout) MXU dot computes all 4 phases.
    patch = jnp.concatenate([a00, a01, a10, a11], axis=-1)           # (TR, W, 4*Cin)
    patch = patch.reshape(TR * W, 4 * Cin)
    y = jnp.dot(patch, w_ref[...], preferred_element_type=jnp.float32)  # (TR*W, 4*Cout)

    y_ref[0] = y
    ssum_ref[0, 0] = jnp.sum(y, axis=0, keepdims=True)               # (1, 4*Cout)
    ssq_ref[0, 0] = jnp.sum(y * y, axis=0, keepdims=True)            # (1, 4*Cout)


def _norm_relu_kernel(y_ref, mean_ref, rstd_ref, o_ref):
    """Pass 2: InstanceNorm(affine=False) normalize + ReLU on one row tile (f32 math)."""
    y = y_ref[0]                                                     # (TR*W, 4*Cout)
    o_ref[0] = jnp.maximum((y - mean_ref[0]) * rstd_ref[0], 0.0).astype(o_ref.dtype)


def _pack_phase_weights(w_t):
    """(Cin, Cout, 3, 3) PyTorch ConvTranspose2d weight -> (4*Cin, 4*Cout) packed matrix.

    out[2i+rp, 2j+cp, co] = sum_{dy,dx,ci} xp[i+dy, j+dx, ci] * Wpk[(2dy+dx)*Cin+ci,
                                                                    (2rp+cp)*Cout+co]
    where (parity, delta) -> transposed-conv tap: (0,0)->1, (1,0)->2, (1,1)->0, (0,1)->none.
    """
    Cin, Cout = w_t.shape[0], w_t.shape[1]
    k_of = {(0, 0): 1, (1, 0): 2, (1, 1): 0}
    w_pk = jnp.zeros((4 * Cin, 4 * Cout), jnp.float32)
    for rp in range(2):
        for cp in range(2):
            p = 2 * rp + cp
            for dy in range(2):
                for dx in range(2):
                    ky = k_of.get((rp, dy))
                    kx = k_of.get((cp, dx))
                    if ky is None or kx is None:
                        continue
                    q = 2 * dy + dx
                    w_pk = w_pk.at[q * Cin:(q + 1) * Cin,
                                   p * Cout:(p + 1) * Cout].set(w_t[:, :, ky, kx])
    return w_pk


def _pick_row_tile(H, W, target_rows=128):
    """Largest divisor of H whose tile has ~target_rows output-patch rows (M ~= 128)."""
    tr = max(1, min(H, max(1, target_rows // max(W, 1))))
    while H % tr != 0:
        tr -= 1
    if (tr * W) % 8 != 0 and tr != H:
        tr = H  # fall back to a single full-extent row tile
    return tr


def convt_blk_forward(x_nchw, w_t, bias):
    """ConvTranspose2d(3,2,1,1) -> InstanceNorm2d(affine=False) -> ReLU.  NCHW in/out.

    x_nchw: (N, Cin, H, W); w_t: (Cin, Cout, 3, 3) [PyTorch layout]; bias: (Cout,).
    NOTE: `bias` is accepted for interface parity but NOT applied: InstanceNorm
    (affine=False) subtracts the per-channel mean, so a per-channel bias cancels exactly.
    """
    del bias
    N, Cin, H, W = x_nchw.shape
    Cout = w_t.shape[1]
    TR = _pick_row_tile(H, W)
    T = H // TR

    # Layout glue: NCHW -> NHWC plus a single zero row/col on the bottom/right
    # (this replaces the 2x zero-dilation + (1,2) padding of the naive formulation).
    x_nhwc = jnp.transpose(x_nchw, (0, 2, 3, 1))
    xp = jnp.pad(x_nhwc, ((0, 0), (0, 1), (0, 1), (0, 0))).astype(jnp.bfloat16)

    w_pk = _pack_phase_weights(w_t).astype(jnp.bfloat16)             # (4*Cin, 4*Cout)

    cp = pltpu.CompilerParams(
        dimension_semantics=("parallel", "parallel"),
        vmem_limit_bytes=32 * 1024 * 1024,
    )

    # ---- pass 1: conv (phase layout) + per-tile sum / sumsq -------------------------
    y_raw, ssum, ssq = pl.pallas_call(
        _conv_phase_kernel,
        out_shape=(
            jax.ShapeDtypeStruct((N, H * W, 4 * Cout), jnp.float32),
            jax.ShapeDtypeStruct((N, T, 1, 4 * Cout), jnp.float32),
            jax.ShapeDtypeStruct((N, T, 1, 4 * Cout), jnp.float32),
        ),
        grid=(N, T),
        in_specs=[
            pl.BlockSpec((1, TR, W + 1, Cin), lambda n, t: (n, t, 0, 0)),
            pl.BlockSpec((1, 1, W + 1, Cin), lambda n, t: (n, (t + 1) * TR, 0, 0)),
            pl.BlockSpec((4 * Cin, 4 * Cout), lambda n, t: (0, 0)),
        ],
        out_specs=(
            pl.BlockSpec((1, TR * W, 4 * Cout), lambda n, t: (n, t, 0)),
            pl.BlockSpec((1, 1, 1, 4 * Cout), lambda n, t: (n, t, 0, 0)),
            pl.BlockSpec((1, 1, 1, 4 * Cout), lambda n, t: (n, t, 0, 0)),
        ),
        compiler_params=cp,
    )(xp, xp, w_pk)

    # ---- tiny global reduction for the InstanceNorm statistics ----------------------
    ch_sum = ssum.sum(axis=(1, 2)).reshape(N, 4, Cout).sum(axis=1)   # (N, Cout)
    ch_sq = ssq.sum(axis=(1, 2)).reshape(N, 4, Cout).sum(axis=1)     # (N, Cout)
    cnt = float(4 * H * W)                                           # = OH * OW
    mean = ch_sum / cnt
    var = ch_sq / cnt - mean * mean
    rstd = jax.lax.rsqrt(var + EPS)
    mean_t = jnp.tile(mean, (1, 4)).reshape(N, 1, 4 * Cout)          # phase-major layout
    rstd_t = jnp.tile(rstd, (1, 4)).reshape(N, 1, 4 * Cout)

    # ---- pass 2: normalize + ReLU ----------------------------------------------------
    out_ph = pl.pallas_call(
        _norm_relu_kernel,
        out_shape=jax.ShapeDtypeStruct((N, H * W, 4 * Cout), jnp.float32),
        grid=(N, T),
        in_specs=[
            pl.BlockSpec((1, TR * W, 4 * Cout), lambda n, t: (n, t, 0)),
            pl.BlockSpec((1, 1, 4 * Cout), lambda n, t: (n, 0, 0)),
            pl.BlockSpec((1, 1, 4 * Cout), lambda n, t: (n, 0, 0)),
        ],
        out_specs=pl.BlockSpec((1, TR * W, 4 * Cout), lambda n, t: (n, t, 0)),
        compiler_params=cp,
    )(y_raw, mean_t, rstd_t)

    # phase layout (n, i*W+j, (2rp+cp)*Cout+c) -> NCHW (n, c, 2i+rp, 2j+cp)
    out = out_ph.reshape(N, H, W, 2, 2, Cout)
    out = jnp.transpose(out, (0, 5, 1, 3, 2, 4)).reshape(N, Cout, 2 * H, 2 * W)
    return out


def ref_forward(x_nchw, w_t, bias):
    """Pure-JAX f32 reference of ConvTranspose2d(3,2,1,1) + InstanceNorm2d + ReLU (NCHW)."""
    x_nhwc = jnp.transpose(x_nchw, (0, 2, 3, 1)).astype(jnp.float32)
    w_hwio = jnp.transpose(w_t, (2, 3, 0, 1))[::-1, ::-1, :, :].astype(jnp.float32)
    y = jax.lax.conv_general_dilated(
        x_nhwc, w_hwio, window_strides=(1, 1),
        padding=((1, 2), (1, 2)), lhs_dilation=(2, 2),
        dimension_numbers=('NHWC', 'HWIO', 'NHWC'))
    y = y + bias.reshape(1, 1, 1, -1)
    mean = jnp.mean(y, axis=(1, 2), keepdims=True)
    var = jnp.mean((y - mean) ** 2, axis=(1, 2), keepdims=True)
    y = jnp.maximum((y - mean) * jax.lax.rsqrt(var + EPS), 0.0)
    return jnp.transpose(y, (0, 3, 1, 2))


if __name__ == "__main__":
    # ConvTBlk(in_ch=4, out_ch=8, norm_layer=nn.InstanceNorm2d, use_bias=True)
    N, Cin, Cout, H, W = 2, 4, 8, 16, 16
    key = jax.random.PRNGKey(0)
    kx, kw, kb = jax.random.split(key, 3)
    x = jax.random.normal(kx, (N, Cin, H, W), jnp.float32)
    # PyTorch ConvTranspose2d weight layout: (in_ch, out_ch, kH, kW)
    w = jax.random.normal(kw, (Cin, Cout, 3, 3), jnp.float32) * 0.1
    b = jax.random.normal(kb, (Cout,), jnp.float32) * 0.1

    out = jax.block_until_ready(jax.jit(convt_blk_forward)(x, w, b))
    ref = jax.block_until_ready(ref_forward(x, w, b))

    assert out.shape == (N, Cout, 2 * H, 2 * W), out.shape
    # bf16 MXU feeds vs a pure-f32 reference -> loosened tolerance.
    assert jnp.allclose(out, ref, atol=5e-2, rtol=5e-2), float(jnp.max(jnp.abs(out - ref)))
    print("KERNEL_OK")
</pallas_src>

<mosaic_0001>
module attributes {stable_mosaic.version = 11 : i64} {
  func.func @_conv_phase_kernel(%arg0: i32, %arg1: i32, %arg2: memref<1x8x17x4xbf16, #tpu.memory_space<vmem>>, %arg3: memref<1x1x17x4xbf16, #tpu.memory_space<vmem>>, %arg4: memref<16x32xbf16, #tpu.memory_space<vmem>>, %arg5: memref<1x128x32xf32, #tpu.memory_space<vmem>>, %arg6: memref<1x1x1x32xf32, #tpu.memory_space<vmem>>, %arg7: memref<1x1x1x32xf32, #tpu.memory_space<vmem>>) attributes {dimension_semantics = [#tpu.dimension_semantics<parallel>, #tpu.dimension_semantics<parallel>], iteration_bounds = array<i64: 2, 2>, scalar_prefetch = 0 : i64, scratch_operands = 0 : i64, tpu.core_type = #tpu.core_type<tc>, window_params = [{transform_indices = @transform_0, window_bounds = array<i64: 1, 8, 17, 4>}, {transform_indices = @transform_1, window_bounds = array<i64: 1, 1, 17, 4>}, {pipeline_mode = #tpu.pipeline_mode<synchronous>, transform_indices = @transform_2, window_bounds = array<i64: 16, 32>}, {transform_indices = @transform_3, window_bounds = array<i64: 1, 128, 32>}, {transform_indices = @transform_4, window_bounds = array<i64: 1, 1, 1, 32>}, {transform_indices = @transform_5, window_bounds = array<i64: 1, 1, 1, 32>}]} {
    %c0 = arith.constant 0 : index
    %c0_0 = arith.constant 0 : index
    %c0_1 = arith.constant 0 : index
    %c0_2 = arith.constant 0 : index
    %0 = vector.load %arg2[%c0, %c0_0, %c0_1, %c0_2] : memref<1x8x17x4xbf16, #tpu.memory_space<vmem>>, vector<1x8x17x4xbf16>
    %1 = vector.shape_cast %0 : vector<1x8x17x4xbf16> to vector<8x17x4xbf16>
    %c0_3 = arith.constant 0 : index
    %c0_4 = arith.constant 0 : index
    %c0_5 = arith.constant 0 : index
    %c0_6 = arith.constant 0 : index
    %2 = vector.load %arg3[%c0_3, %c0_4, %c0_5, %c0_6] : memref<1x1x17x4xbf16, #tpu.memory_space<vmem>>, vector<1x1x17x4xbf16>
    %3 = vector.shape_cast %2 : vector<1x1x17x4xbf16> to vector<1x17x4xbf16>
    %4 = tpu.concatenate %1, %3 in 0 : vector<8x17x4xbf16>, vector<1x17x4xbf16> -> vector<9x17x4xbf16>
    %5 = vector.extract_strided_slice %4 {offsets = [0, 0, 0], sizes = [8, 16, 4], strides = [1, 1, 1]} : vector<9x17x4xbf16> to vector<8x16x4xbf16>
    %6 = vector.extract_strided_slice %4 {offsets = [0, 1, 0], sizes = [8, 16, 4], strides = [1, 1, 1]} : vector<9x17x4xbf16> to vector<8x16x4xbf16>
    %7 = vector.extract_strided_slice %4 {offsets = [1, 0, 0], sizes = [8, 16, 4], strides = [1, 1, 1]} : vector<9x17x4xbf16> to vector<8x16x4xbf16>
    %8 = vector.extract_strided_slice %4 {offsets = [1, 1, 0], sizes = [8, 16, 4], strides = [1, 1, 1]} : vector<9x17x4xbf16> to vector<8x16x4xbf16>
    %9 = tpu.concatenate %5, %6, %7, %8 in 2 : vector<8x16x4xbf16>, vector<8x16x4xbf16>, vector<8x16x4xbf16>, vector<8x16x4xbf16> -> vector<8x16x16xbf16>
    %10 = vector.shape_cast %9 : vector<8x16x16xbf16> to vector<128x16xbf16>
    %c0_7 = arith.constant 0 : index
    %c0_8 = arith.constant 0 : index
    %11 = vector.load %arg4[%c0_7, %c0_8] : memref<16x32xbf16, #tpu.memory_space<vmem>>, vector<16x32xbf16>
    %cst = arith.constant dense<0.000000e+00> : vector<128x32xf32>
    %12 = tpu.matmul %10, %11, %cst {dimension_numbers = #tpu.dot_dimension_numbers<[1], [0], [0], [1], [0, 0, 1, 1], [], []>} : vector<128x16xbf16>, vector<16x32xbf16>, vector<128x32xf32> -> vector<128x32xf32>
    %c0_9 = arith.constant 0 : index
    %c0_10 = arith.constant 0 : index
    %c0_11 = arith.constant 0 : index
    %13 = vector.load %arg5[%c0_9, %c0_10, %c0_11] : memref<1x128x32xf32, #tpu.memory_space<vmem>>, vector<1x128x32xf32>
    %14 = vector.shape_cast %13 : vector<1x128x32xf32> to vector<128x32xf32>
    %15 = vector.shape_cast %12 : vector<128x32xf32> to vector<1x128x32xf32>
    tpu.vector_store %arg5[%c0_9, %c0_10, %c0_11], %15 {strides = array<i32>} : memref<1x128x32xf32, #tpu.memory_space<vmem>>, vector<1x128x32xf32>,
    %cst_12 = arith.constant dense<0.000000e+00> : vector<32xf32>
    %16 = vector.multi_reduction <add>, %12, %cst_12 [0] : vector<128x32xf32> to vector<32xf32>
    %17 = vector.shape_cast %16 : vector<32xf32> to vector<1x32xf32>
    %c0_13 = arith.constant 0 : index
    %c0_14 = arith.constant 0 : index
    %c0_15 = arith.constant 0 : index
    %c0_16 = arith.constant 0 : index
    %18 = vector.load %arg6[%c0_13, %c0_14, %c0_15, %c0_16] : memref<1x1x1x32xf32, #tpu.memory_space<vmem>>, vector<1x1x1x32xf32>
    %19 = vector.shape_cast %18 : vector<1x1x1x32xf32> to vector<1x32xf32>
    %20 = vector.shape_cast %17 : vector<1x32xf32> to vector<1x1x1x32xf32>
    tpu.vector_store %arg6[%c0_13, %c0_14, %c0_15, %c0_16], %20 {strides = array<i32>} : memref<1x1x1x32xf32, #tpu.memory_space<vmem>>, vector<1x1x1x32xf32>,
    %21 = arith.mulf %12, %12 : vector<128x32xf32>
    %cst_17 = arith.constant dense<0.000000e+00> : vector<32xf32>
    %22 = vector.multi_reduction <add>, %21, %cst_17 [0] : vector<128x32xf32> to vector<32xf32>
    %23 = vector.shape_cast %22 : vector<32xf32> to vector<1x32xf32>
    %c0_18 = arith.constant 0 : index
    %c0_19 = arith.constant 0 : index
    %c0_20 = arith.constant 0 : index
    %c0_21 = arith.constant 0 : index
    %24 = vector.load %arg7[%c0_18, %c0_19, %c0_20, %c0_21] : memref<1x1x1x32xf32, #tpu.memory_space<vmem>>, vector<1x1x1x32xf32>
    %25 = vector.shape_cast %24 : vector<1x1x1x32xf32> to vector<1x32xf32>
    %26 = vector.shape_cast %23 : vector<1x32xf32> to vector<1x1x1x32xf32>
    tpu.vector_store %arg7[%c0_18, %c0_19, %c0_20, %c0_21], %26 {strides = array<i32>} : memref<1x1x1x32xf32, #tpu.memory_space<vmem>>, vector<1x1x1x32xf32>,
    return
  }
  func.func @transform_0(%arg0: i32, %arg1: i32) -> (i32, i32, i32, i32) {
    %c0_i32 = arith.constant 0 : i32
    %c0_i32_0 = arith.constant 0 : i32
    %c0_i32_1 = arith.constant 0 : i32
    return %arg0, %arg1, %c0_i32, %c0_i32_0 : i32, i32, i32, i32
  }
  func.func @transform_1(%arg0: i32, %arg1: i32) -> (i32, i32, i32, i32) {
    %c1_i32 = arith.constant 1 : i32
    %0 = arith.addi %arg1, %c1_i32 : i32
    %c8_i32 = arith.constant 8 : i32
    %1 = arith.muli %0, %c8_i32 : i32
    %c0_i32 = arith.constant 0 : i32
    %c0_i32_0 = arith.constant 0 : i32
    %c0_i32_1 = arith.constant 0 : i32
    return %arg0, %1, %c0_i32, %c0_i32_0 : i32, i32, i32, i32
  }
  func.func @transform_2(%arg0: i32, %arg1: i32) -> (i32, i32) {
    %c0_i32 = arith.constant 0 : i32
    %c0_i32_0 = arith.constant 0 : i32
    %c0_i32_1 = arith.constant 0 : i32
    return %c0_i32, %c0_i32_0 : i32, i32
  }
  func.func @transform_3(%arg0: i32, %arg1: i32) -> (i32, i32, i32) {
    %c0_i32 = arith.constant 0 : i32
    %c0_i32_0 = arith.constant 0 : i32
    return %arg0, %arg1, %c0_i32 : i32, i32, i32
  }
  func.func @transform_4(%arg0: i32, %arg1: i32) -> (i32, i32, i32, i32) {
    %c0_i32 = arith.constant 0 : i32
    %c0_i32_0 = arith.constant 0 : i32
    %c0_i32_1 = arith.constant 0 : i32
    return %arg0, %arg1, %c0_i32, %c0_i32_0 : i32, i32, i32, i32
  }
  func.func @transform_5(%arg0: i32, %arg1: i32) -> (i32, i32, i32, i32) {
    %c0_i32 = arith.constant 0 : i32
    %c0_i32_0 = arith.constant 0 : i32
    %c0_i32_1 = arith.constant 0 : i32
    return %arg0, %arg1, %c0_i32, %c0_i32_0 : i32, i32, i32, i32
  }
}

module attributes {stable_mosaic.version = 11 : i64} {
  func.func @_norm_relu_kernel(%arg0: i32, %arg1: i32, %arg2: memref<1x128x32xf32, #tpu.memory_space<vmem>>, %arg3: memref<1x1x32xf32, #tpu.memory_space<vmem>>, %arg4: memref<1x1x32xf32, #tpu.memory_space<vmem>>, %arg5: memref<1x128x32xf32, #tpu.memory_space<vmem>>) attributes {dimension_semantics = [#tpu.dimension_semantics<parallel>, #tpu.dimension_semantics<parallel>], iteration_bounds = array<i64: 2, 2>, scalar_prefetch = 0 : i64, scratch_operands = 0 : i64, tpu.core_type = #tpu.core_type<tc>, window_params = [{transform_indices = @transform_0, window_bounds = array<i64: 1, 128, 32>}, {transform_indices = @transform_1, window_bounds = array<i64: 1, 1, 32>}, {transform_indices = @transform_2, window_bounds = array<i64: 1, 1, 32>}, {transform_indices = @transform_3, window_bounds = array<i64: 1, 128, 32>}]} {
    %c0 = arith.constant 0 : index
    %c0_0 = arith.constant 0 : index
    %c0_1 = arith.constant 0 : index
    %0 = vector.load %arg2[%c0, %c0_0, %c0_1] : memref<1x128x32xf32, #tpu.memory_space<vmem>>, vector<1x128x32xf32>
    %1 = vector.shape_cast %0 : vector<1x128x32xf32> to vector<128x32xf32>
    %c0_2 = arith.constant 0 : index
    %c0_3 = arith.constant 0 : index
    %c0_4 = arith.constant 0 : index
    %2 = vector.load %arg3[%c0_2, %c0_3, %c0_4] : memref<1x1x32xf32, #tpu.memory_space<vmem>>, vector<1x1x32xf32>
    %3 = vector.shape_cast %2 : vector<1x1x32xf32> to vector<1x32xf32>
    %4 = vector.broadcast %3 : vector<1x32xf32> to vector<128x32xf32>
    %5 = arith.subf %1, %4 : vector<128x32xf32>
    %c0_5 = arith.constant 0 : index
    %c0_6 = arith.constant 0 : index
    %c0_7 = arith.constant 0 : index
    %6 = vector.load %arg4[%c0_5, %c0_6, %c0_7] : memref<1x1x32xf32, #tpu.memory_space<vmem>>, vector<1x1x32xf32>
    %7 = vector.shape_cast %6 : vector<1x1x32xf32> to vector<1x32xf32>
    %8 = vector.broadcast %7 : vector<1x32xf32> to vector<128x32xf32>
    %9 = arith.mulf %5, %8 : vector<128x32xf32>
    %cst = arith.constant 0.000000e+00 : f32
    %10 = vector.broadcast %cst : f32 to vector<128x32xf32>
    %11 = arith.maximumf %9, %10 : vector<128x32xf32>
    %c0_8 = arith.constant 0 : index
    %c0_9 = arith.constant 0 : index
    %c0_10 = arith.constant 0 : index
    %12 = vector.load %arg5[%c0_8, %c0_9, %c0_10] : memref<1x128x32xf32, #tpu.memory_space<vmem>>, vector<1x128x32xf32>
    %13 = vector.shape_cast %12 : vector<1x128x32xf32> to vector<128x32xf32>
    %14 = vector.shape_cast %11 : vector<128x32xf32> to vector<1x128x32xf32>
    tpu.vector_store %arg5[%c0_8, %c0_9, %c0_10], %14 {strides = array<i32>} : memref<1x128x32xf32, #tpu.memory_space<vmem>>, vector<1x128x32xf32>,
    return
  }
  func.func @transform_0(%arg0: i32, %arg1: i32) -> (i32, i32, i32) {
    %c0_i32 = arith.constant 0 : i32
    %c0_i32_0 = arith.constant 0 : i32
    return %arg0, %arg1, %c0_i32 : i32, i32, i32
  }
  func.func @transform_1(%arg0: i32, %arg1: i32) -> (i32, i32, i32) {
    %c0_i32 = arith.constant 0 : i32
    %c0_i32_0 = arith.constant 0 : i32
    %c0_i32_1 = arith.constant 0 : i32
    return %arg0, %c0_i32, %c0_i32_0 : i32, i32, i32
  }
  func.func @transform_2(%arg0: i32, %arg1: i32) -> (i32, i32, i32) {
    %c0_i32 = arith.constant 0 : i32
    %c0_i32_0 = arith.constant 0 : i32
    %c0_i32_1 = arith.constant 0 : i32
    return %arg0, %c0_i32, %c0_i32_0 : i32, i32, i32
  }
  func.func @transform_3(%arg0: i32, %arg1: i32) -> (i32, i32, i32) {
    %c0_i32 = arith.constant 0 : i32
    %c0_i32_0 = arith.constant 0 : i32
    return %arg0, %arg1, %c0_i32 : i32, i32, i32
  }
}

</mosaic_0001>

<bundles_post_ra>
// kernel: convt_blk_forward.3
= control target key start
LH: loop header
LB: loop body
LE: loop exit
PB: predicated region body
PF: predicated region fallthrough
CT: control target
= control target key end

     0   :  { %s556_s12 = smov 0   ;;  %s558_s13 = smov 0   ;;  %s701_s0 = inlined_call_operand.vmem [shape: f32[2,256,32], index: 0, kind: input, shape index: {}]   ;;  %s702_s1 = inlined_call_operand.vmem [shape: f32[2,1,32], index: 1, kind: input, shape index: {}]   ;;  %s703_s2 = inlined_call_operand.vmem [shape: f32[2,1,32], index: 2, kind: input, shape index: {}]   ;;  %s704_s3 = inlined_call_operand.vmem [shape: f32[2,256,32], index: 3, kind: output, shape index: {}]  }
   0x1   :  { %s560_s14 = smov 0   ;;  %s562_s15 = smov 0  }
   0x2   :  { %s564_s16 = smov 0  }
   0x3 LB: > { %s22_s17 = sadd.s32 1, %s526_s14  ;;  %s25_s18 = sadd.s32 1, %s530_s15  ;;  %s534_s16 = sphi %s564_s16, %s13_s16   ;;  %s530_s15 = sphi %s562_s15, %s708_s15   ;;  %s526_s14 = sphi %s560_s14, %s707_s14   ;;  %s522_s13 = sphi %s558_s13, %s706_s13   ;;  %s518_s12 = sphi %s556_s12, %s705_s12  }
   0x4   : > { %p23_p0 = scmp.ge.s32.totalorder %s22_s17, 2  ;;  %p445_p1 = scmp.ge.s32.totalorder %s534_s16, 1 }
   0x5   : > { %p174_p2 = scmp.lt.s32.totalorder %s534_s16, 5 }
   0x6   : > { %s710_s17 = smov (%p23_p0, %s22_s17), 0  ;;  %s712_s18 = smov (!%p23_p0, %s25_s18), %s530_s15 }
   0x7   : > { %p175_p3 = pnand %p445_p1, %p174_p2  ;;  %p27_p4 = scmp.ge.s32.totalorder %s712_s18, 2 }
   0x8   : > { %s446_s19 = sshll.u32 (!%p175_p3), %s518_s12, 4  ;;  %p213_p5 = scmp.lt.s32.totalorder (!%p175_p3), %s522_s13, 1 }
   0x9   : > { %s714_s18 = smov (%p27_p4, %s712_s18), 0  ;;  %178 = sbr.rel (%p175_p3) target bundleno = 37 (0x25), region = 32 }
   0xa   : > { %p215_p6 = scmp.lt.s32.totalorder (!%p175_p3), %s446_s19, 31 }
   0xe   : > { %s716_s13 = smov (!%p213_p5, %s522_s13), 1  ;;  %s718_s19 = smov (!%p215_p6, %s446_s19), 31  ;;  %vm316_vm0 = vcmask 261120  }
   0xf   : > { %s447_s20 = sshll.u32 %s716_s13, 5  ;;  %s224_s23 = scalar_lea.vmem %s702_s1, %s716_s13 }
  0x10   : > { %s218_s24 = sadd.s32 %s447_s20, %s718_s19  ;;  %s227_s27 = scalar_lea.vmem %s703_s2, %s716_s13  ;;  %v592_v0 = vld [vmem:[%s224_s23] ss:$0 sm:$0xff] }
  0x11   : > { %s448_s28 = sshll.u32 %s218_s24, 3  ;;  %v599_v1 = vld [vmem:[%s227_s27] ss:$0 sm:$0xff] }
  0x12   : > { %s597_s4 = scalar_lea.vmem %s701_s0, %s448_s28  ;;  %s622_s7 = scalar_lea.vmem %s704_s3, %s448_s28 }
  0x13   : > { %v238_v2 = vld [vmem:[%s597_s4] sm:$0xff]  ;;  %v239_v3 = vld [vmem:[%s597_s4 + $0x8] sm:$0xff]  ;;  %v240_v4 = vld [vmem:[%s597_s4 + $0x10] sm:$0xff] }
  0x14   : > { %v261_v5 = vsub.f32 %v238_v2, %v592_v0  ;;  %v262_v6 = vsub.f32 %v239_v3, %v592_v0  ;;  %v263_v7 = vsub.f32 %v240_v4, %v592_v0  ;;  %v241_v8 = vld [vmem:[%s597_s4 + $0x18] sm:$0xff]  ;;  %v242_v9 = vld [vmem:[%s597_s4 + $0x20] sm:$0xff]  ;;  %v243_v10 = vld [vmem:[%s597_s4 + $0x28] sm:$0xff] }
  0x15   : > { %v264_v11 = vsub.f32 %v241_v8, %v592_v0  ;;  %v265_v12 = vsub.f32 %v242_v9, %v592_v0  ;;  %v266_v13 = vsub.f32 %v243_v10, %v592_v0  ;;  %v244_v14 = vld [vmem:[%s597_s4 + $0x30] sm:$0xff]  ;;  %v245_v15 = vld [vmem:[%s597_s4 + $0x38] sm:$0xff]  ;;  %v246_v24 = vld [vmem:[%s597_s4 + $0x40] sm:$0xff] }
  0x16   : > { %v284_v16 = vmul.f32 %v599_v1, %v261_v5  ;;  %v285_v17 = vmul.f32 %v599_v1, %v262_v6  ;;  %v286_v18 = vmul.f32 %v599_v1, %v263_v7  ;;  %v267_v19 = vsub.f32 %v244_v14, %v592_v0  ;;  %v247_v25 = vld [vmem:[%s597_s4 + $0x48] sm:$0xff]  ;;  %v248_v26 = vld [vmem:[%s597_s4 + $0x50] sm:$0xff]  ;;  %v249_v31 = vld [vmem:[%s597_s4 + $0x58] sm:$0xff] }
  0x17   : > { %v287_v20 = vmul.f32 %v599_v1, %v264_v11  ;;  %v288_v21 = vmul.f32 %v599_v1, %v265_v12  ;;  %v289_v22 = vmul.f32 %v599_v1, %v266_v13  ;;  %v268_v23 = vsub.f32 %v245_v15, %v592_v0  ;;  %v250_v32 = vld [vmem:[%s597_s4 + $0x60] sm:$0xff]  ;;  %v251_v33 = vld [vmem:[%s597_s4 + $0x68] sm:$0xff]  ;;  %v252_v38 = vld [vmem:[%s597_s4 + $0x70] sm:$0xff] }
  0x18   : > { %v300_v27 = vmax.f32 %v284_v16, 0.0  ;;  %v301_v28 = vmax.f32 %v285_v17, 0.0  ;;  %v302_v29 = vmax.f32 %v286_v18, 0.0  ;;  %v290_v30 = vmul.f32 %v599_v1, %v267_v19  ;;  %v253_v43 = vld [vmem:[%s597_s4 + $0x78] sm:$0xff] }
  0x19   : > { %v303_v34 = vmax.f32 %v287_v20, 0.0  ;;  %v304_v35 = vmax.f32 %v288_v21, 0.0  ;;  %v305_v36 = vmax.f32 %v289_v22, 0.0  ;;  %v291_v37 = vmul.f32 %v599_v1, %v268_v23 }
  0x1a   : > { %317 = vst.msk [vmem:[%s622_s7] sm:$0xff] %vm316_vm0, %v300_v27  ;;  %318 = vst.msk [vmem:[%s622_s7 + $0x8] sm:$0xff] %vm316_vm0, %v301_v28  ;;  %v306_v39 = vmax.f32 %v290_v30, 0.0  ;;  %v269_v40 = vsub.f32 %v246_v24, %v592_v0  ;;  %v270_v41 = vsub.f32 %v247_v25, %v592_v0  ;;  %v271_v42 = vsub.f32 %v248_v26, %v592_v0 }
  0x1b   : > { %319 = vst.msk [vmem:[%s622_s7 + $0x10] sm:$0xff] %vm316_vm0, %v302_v29  ;;  %320 = vst.msk [vmem:[%s622_s7 + $0x18] sm:$0xff] %vm316_vm0, %v303_v34  ;;  %v307_v44 = vmax.f32 %v291_v37, 0.0  ;;  %v272_v45 = vsub.f32 %v249_v31, %v592_v0  ;;  %v273_v46 = vsub.f32 %v250_v32, %v592_v0  ;;  %v274_v47 = vsub.f32 %v251_v33, %v592_v0 }
  0x1c   : > { %321 = vst.msk [vmem:[%s622_s7 + $0x20] sm:$0xff] %vm316_vm0, %v304_v35  ;;  %322 = vst.msk [vmem:[%s622_s7 + $0x28] sm:$0xff] %vm316_vm0, %v305_v36  ;;  %v292_v48 = vmul.f32 %v599_v1, %v269_v40  ;;  %v293_v49 = vmul.f32 %v599_v1, %v270_v41  ;;  %v294_v50 = vmul.f32 %v599_v1, %v271_v42 }
  0x1d   : > { %323 = vst.msk [vmem:[%s622_s7 + $0x30] sm:$0xff] %vm316_vm0, %v306_v39  ;;  %v275_v51 = vsub.f32 %v252_v38, %v592_v0  ;;  %324 = vst.msk [vmem:[%s622_s7 + $0x38] sm:$0xff] %vm316_vm0, %v307_v44  ;;  %v295_v52 = vmul.f32 %v599_v1, %v272_v45  ;;  %v296_v53 = vmul.f32 %v599_v1, %v273_v46 }
  0x1e   : > { %v297_v54 = vmul.f32 %v599_v1, %v274_v47  ;;  %v276_v55 = vsub.f32 %v253_v43, %v592_v0  ;;  %v308_v56 = vmax.f32 %v292_v48, 0.0  ;;  %v309_v57 = vmax.f32 %v293_v49, 0.0 }
  0x1f   : > { %v310_v58 = vmax.f32 %v294_v50, 0.0  ;;  %v298_v59 = vmul.f32 %v599_v1, %v275_v51  ;;  %v311_v60 = vmax.f32 %v295_v52, 0.0  ;;  %v312_v61 = vmax.f32 %v296_v53, 0.0 }
  0x20   : > { %v313_v62 = vmax.f32 %v297_v54, 0.0  ;;  %v299_v63 = vmul.f32 %v599_v1, %v276_v55  ;;  %325 = vst.msk [vmem:[%s622_s7 + $0x40] sm:$0xff] %vm316_vm0, %v308_v56  ;;  %326 = vst.msk [vmem:[%s622_s7 + $0x48] sm:$0xff] %vm316_vm0, %v309_v57 }
  0x21   : > { %327 = vst.msk [vmem:[%s622_s7 + $0x50] sm:$0xff] %vm316_vm0, %v310_v58  ;;  %v314_v2 = vmax.f32 %v298_v59, 0.0  ;;  %328 = vst.msk [vmem:[%s622_s7 + $0x58] sm:$0xff] %vm316_vm0, %v311_v60 }
  0x22   : > { %329 = vst.msk [vmem:[%s622_s7 + $0x60] sm:$0xff] %vm316_vm0, %v312_v61  ;;  %330 = vst.msk [vmem:[%s622_s7 + $0x68] sm:$0xff] %vm316_vm0, %v313_v62  ;;  %v315_v0 = vmax.f32 %v299_v63, 0.0 }
  0x23   : > { %331 = vst.msk [vmem:[%s622_s7 + $0x70] sm:$0xff] %vm316_vm0, %v314_v2 }
  0x24   : > { %332 = vst.msk [vmem:[%s622_s7 + $0x78] sm:$0xff] %vm316_vm0, %v315_v0 }
  0x25 PF: > { %s13_s16 = sadd.s32 1, %s534_s16   ;;  %s705_s12 = smov %s526_s14 }
  0x26   : > { %p10_p7 = scmp.ge.s32.totalorder %s13_s16, 6   ;;  %s706_s13 = smov %s530_s15 }
  0x27   : > { %s707_s14 = smov %s710_s17  ;;  %s708_s15 = smov %s714_s18 }
  0x28   :  { %12 = sbr.rel (!%p10_p7) target bundleno = 3 (0x3), region = 68 }

// kernel: convt_blk_forward.2
= control target key start
LH: loop header
LB: loop body
LE: loop exit
PB: predicated region body
PF: predicated region fallthrough
CT: control target
= control target key end

     0   :  { %s1331_s18 = smov 0   ;;  %s1333_s19 = smov 0   ;;  %s1620_s0 = inlined_call_operand.vmem [shape: bf16[2,17,17,4], index: 0, kind: input, shape index: {}, may-alias: {0,1}]   ;;  %s1621_s1 = inlined_call_operand.vmem [shape: bf16[2,17,17,4], index: 1, kind: input, shape index: {}, may-alias: {0,1}]   ;;  %s1622_s2 = inlined_call_operand.vmem [shape: bf16[16,32], index: 2, kind: input, shape index: {}]   ;;  %s1623_s3 = inlined_call_operand.vmem [shape: f32[2,256,32], index: 3, kind: output, shape index: {0}]   ;;  %s1624_s4 = inlined_call_operand.vmem [shape: f32[2,2,1,32], index: 4, kind: output, shape index: {1}]   ;;  %s1625_s5 = inlined_call_operand.vmem [shape: f32[2,2,1,32], index: 5, kind: output, shape index: {2}]  }
   0x1   :  { %s1335_s20 = smov 0   ;;  %s1337_s21 = smov 0  }
   0x2   :  { %s1339_s22 = smov 0  }
   0x3 LB: > { %s25_s23 = sadd.s32 1, %s1288_s20  ;;  %s28_s24 = sadd.s32 1, %s1292_s21  ;;  %s1296_s22 = sphi %s1339_s22, %s16_s22   ;;  %s1292_s21 = sphi %s1337_s21, %s1630_s21   ;;  %s1288_s20 = sphi %s1335_s20, %s1629_s20   ;;  %s1284_s19 = sphi %s1333_s19, %s1628_s19   ;;  %s1280_s18 = sphi %s1331_s18, %s1627_s18  }
   0x4   : > { %p26_p0 = scmp.ge.s32.totalorder %s25_s23, 2  ;;  %p1119_p1 = scmp.ge.s32.totalorder %s1296_s22, 1 }
   0x5   : > { %p252_p2 = scmp.lt.s32.totalorder %s1296_s22, 5 }
   0x6   : > { %s1632_s23 = smov (%p26_p0, %s25_s23), 0  ;;  %s1634_s24 = smov (!%p26_p0, %s28_s24), %s1292_s21 }
   0x7   : > { %p253_p3 = pnand %p1119_p1, %p252_p2  ;;  %p30_p4 = scmp.ge.s32.totalorder %s1634_s24, 2 }
   0x8   : > { %s1364_s25 = sshll.u32 (!%p253_p3), %s1280_s18, 3  ;;  %p325_p5 = scmp.lt.s32.totalorder (!%p253_p3), %s1284_s19, 1 }
   0x9   : > { %s1636_s24 = smov (%p30_p4, %s1634_s24), 0  ;;  %256 = sbr.rel (%p253_p3) target bundleno = 409 (0x199), region = 32 }
   0xa   : > { %p327_p6 = scmp.lt.s32.totalorder (!%p253_p3), %s1364_s25, 16  ;;  %s1163_s9 = sadd.s32 (!%p253_p3), 8, %s1364_s25 }
   0xb   : > { %s1298_s10 = smov (!%p253_p3), 8   ;;  %p1409_p7 = scmp.lt.s32.totalorder (!%p253_p3), %s1163_s9, 16 }
   0xc   : > { %s1299_s12 = smov (!%p253_p3), 4   ;;  %s1300_s13 = smov (!%p253_p3), 12  }
   0xd   : > { %p365_p9 = scmp.lt.s32.totalorder (!%p253_p3), %s1280_s18, 1 }
   0xe   : > { %s1638_s19 = smov (!%p325_p5, %s1284_s19), 1  ;;  %vm469_vm0 = vsmask.f32 7424  ;;  %s1640_s9 = smov (!%p1409_p7, %s1163_s9), 16  ;;  %v1257_v51 = vld [vmem:[%s1622_s2] sm:$0xff]   ;;  %vm634_vm1 = vcmask 31744  }
   0xf   : > { %s328_s26 = scalar_select %p327_p6, %s1364_s25, 16  ;;  %1173 = vmatprep.subr.bf16.mxu0 %v1257_v51  ;;  %1191 = vmatprep.subr.bf16.mxu1 %v1257_v51  ;;  %vm651_vm2 = vcmask 64512   ;;  %vm668_vm3 = vcmask 97280   ;;  %vm693_vm4 = vcmask 130048   ;;  %vm807_vm5 = vcmask 261120  }
  0x10   : > { %s1194_s27 = smul.u32 51, %s1638_s19  ;;  %1174 = vmatpush3.bf16.msra.mxu0 %v1257_v51  ;;  %1192 = vmatpush3.bf16.msra.mxu1 %v1257_v51  ;;  %s1127_s11 = sshll.u32 %s1638_s19, 1  ;;  %vm861_vm6 = vcmask 253952  }
  0x11   : > { %s1193_s28 = smul.u32 3, %s328_s26 }
  0x12   : > { %s1195_s14 = smul.u32 3, %s1640_s9 }
  0x13   : > { %s331_s29 = sadd.s32 %s1194_s27, %s1193_s28 }
  0x14   : > { %s1121_s30 = sshll.u32 %s331_s29, 2  ;;  %s348_s17 = sadd.s32 %s1195_s14, %s1194_s27 }
  0x15   : > { %s1376_s8 = scalar_lea.vmem %s1620_s0, %s1121_s30  ;;  %s1123_s25 = sshll.u32 %s348_s17, 2 }
  0x16   : > { %v1379_v0 = vld [vmem:[%s1376_s8 + $0xc] sm:$0xff]   ;;  %v1382_v1 = vld [vmem:[%s1376_s8 + $0x24] sm:$0xff]   ;;  %v1388_v2 = vld [vmem:[%s1376_s8 + $0x18] sm:$0xff]   ;;  %s350_s29 = scalar_lea.vmem %s1621_s1, %s1123_s25  ;;  %s1124_s27 = sshll.u32 %s1280_s18, 4 }
  0x17   : > { %587 = vrot.lane.b32.xlu1 %v1379_v0, %s1298_s10  ;;  %v483_v3 = vshrl.u32 %v1379_v0, 16  ;;  %591 = vrot.lane.b32.xlu0 %v1382_v1, %s1298_s10  ;;  %v1394_v4 = vld [vmem:[%s1376_s8] sm:$0xff]   ;;  %v1243_v5 = vld [vmem:[%s1376_s8 + $0x8] ss:$0 sps:$4 sm:$0x11]   ;;  %v485_v7 = vshll.u32 %v1379_v0, 16 }
  0x18   : > { %v1398_v6 = vld [vmem:[%s1376_s8 + $0x30] sm:$0xff]   ;;  %v471_v8 = vshrl.u32 %v1394_v4, 16  ;;  %v473_v9 = vshll.u32 %v1394_v4, 16  ;;  %v478_v10 = vshll.u32 %v1243_v5, 16  ;;  %v495_v18 = vshrl.u32 %v1388_v2, 16  ;;  %v1421_v26 = vld [vmem:[%s1376_s8 + $0x3c] sm:$0xff]  }
  0x19   : > { %v1245_v11 = vld [vmem:[%s1376_s8 + $0x14] ss:$0 sps:$4 sm:$0x11]   ;;  %v487_v12 = vrot.slane %v485_v7, 1  ;;  %v497_v19 = vshll.u32 %v1388_v2, 16  ;;  %v507_v24 = vshrl.u32 %v1382_v1, 16 }
  0x1a   : > { %v1246_v13 = vld [vmem:[%s1376_s8 + $0x20] ss:$0 sps:$4 sm:$0x11]   ;;  %v475_v14 = vrot.slane %v473_v9, 1  ;;  %v480_v15 = vrot.slane %v478_v10, 1  ;;  %v490_v16 = vshll.u32 %v1245_v11, 16 }
  0x1b   : > { %589 = vrot.lane.b32.xlu1 %v1388_v2, %s1298_s10  ;;  %v488_v17 = vor.u32 %v487_v12, %v483_v3  ;;  %v502_v20 = vshll.u32 %v1246_v13, 16  ;;  %v1247_v21 = vld [vmem:[%s1376_s8 + $0x2c] ss:$0 sps:$4 sm:$0x11]   ;;  %v509_v25 = vshll.u32 %v1382_v1, 16  ;;  %v499_v27 = vrot.slane %v497_v19, 1 }
  0x1c   : > { %v476_v22 = vor.u32 %v475_v14, %v471_v8  ;;  %v492_v23 = vrot.slane %v490_v16, 1  ;;  %v514_v29 = vshll.u32 %v1247_v21, 16  ;;  %v1248_v30 = vld [vmem:[%s1376_s8 + $0x38] ss:$0 sps:$4 sm:$0x11]   ;;  %v521_v33 = vshll.u32 %v1398_v6, 16 }
  0x1d   : > { %v504_v28 = vrot.slane %v502_v20, 1  ;;  %v511_v32 = vrot.slane %v509_v25, 1  ;;  %v500_v34 = vor.u32 %v499_v27, %v495_v18  ;;  %v519_v36 = vshrl.u32 %v1398_v6, 16  ;;  %v1250_v41 = vld [vmem:[%s1376_s8 + $0x44] ss:$0 sps:$4 sm:$0x11]  }
  0x1e   : > { %v481_v31 = vsel %vm469_vm0, %v476_v22, %v480_v15  ;;  %v516_v35 = vrot.slane %v514_v29, 1  ;;  %v526_v37 = vshll.u32 %v1248_v30, 16  ;;  %v493_v38 = vsel %vm469_vm0, %v488_v17, %v492_v23  ;;  %v1441_v50 = vld [vmem:[%s1376_s8 + $0x48] sm:$0xff]   ;;  %v1252_v55 = vld [vmem:[%s1376_s8 + $0x50] ss:$0 sps:$4 sm:$0x11]  }
  0x1f   : > { %593 = vrot.lane.b32.xlu1 %v1398_v6, %s1298_s10  ;;  %566 = vrot.lane.b32.xlu0 %v481_v31, %s1299_s12  ;;  %v512_v39 = vor.u32 %v511_v32, %v507_v24  ;;  %v523_v40 = vrot.slane %v521_v33, 1  ;;  %v533_v42 = vshll.u32 %v1421_v26, 16  ;;  %v505_v43 = vsel %vm469_vm0, %v500_v34, %v504_v28  ;;  %v1452_v57 = vld [vmem:[%s1376_s8 + $0x54] sm:$0xff]   ;;  %v1254_v58 = vld [vmem:[%s1376_s8 + $0x5c] ss:$0 sps:$4 sm:$0x11]  }
  0x20   : > { %v528_v44 = vrot.slane %v526_v37, 1  ;;  %v531_v45 = vshrl.u32 %v1421_v26, 16  ;;  %v538_v49 = vshll.u32 %v1250_v41, 16  ;;  %v545_v56 = vshll.u32 %v1441_v50, 16  ;;  %v1255_v10 = vld [vmem:[%s350_s29] sm:$0xff]   ;;  %p356_p8 = scmp.lt.s32.totalorder %s1124_s27, 31 }
  0x21   : > { %v517_v46 = vsel %vm469_vm0, %v512_v39, %v516_v35  ;;  %v524_v47 = vor.u32 %v523_v40, %v519_v36  ;;  %v535_v48 = vrot.slane %v533_v42, 1  ;;  %v543_v59 = vshrl.u32 %v1441_v50, 16  ;;  %v1256_v15 = vld [vmem:[%s350_s29 + $0x8] ss:$0 sps:$4 sm:$0x11]   ;;  %s1125_s30 = sshll.u32 %s1638_s19, 5 }
  0x22   : > { %v540_v54 = vrot.slane %v538_v49, 1  ;;  %v547_v61 = vrot.slane %v545_v56, 1  ;;  %v550_v62 = vshll.u32 %v1252_v55, 16  ;;  %v557_v63 = vshll.u32 %v1452_v57, 16  ;;  %s1642_s27 = smov (!%p356_p8, %s1124_s27), 31  ;;  %s1644_s18 = smov (!%p365_p9, %s1280_s18), 1 }
  0x23   : > { %620 = vrot.lane.b32.xlu1 %v505_v43, %s1300_s13  ;;  %568 = vrot.lane.b32.xlu0 %v493_v38, %s1299_s12  ;;  %v529_v52 = vsel %vm469_vm0, %v524_v47, %v528_v44  ;;  %v536_v53 = vor.u32 %v535_v48, %v531_v45  ;;  %v555_v3 = vshrl.u32 %v1452_v57, 16  ;;  %v562_v9 = vshll.u32 %v1254_v58, 16  ;;  %s359_s6 = sadd.s32 %s1125_s30, %s1642_s27 }
  0x24   : > { %v548_v5 = vor.u32 %v547_v61, %v543_v59  ;;  %v552_v7 = vrot.slane %v550_v62, 1  ;;  %v559_v8 = vrot.slane %v557_v63, 1  ;;  %v609_v14 = vshll.u32 %v1255_v10, 16  ;;  %s1126_s7 = sshll.u32 %s359_s6, 3 }
  0x25   : > { %v541_v60 = vsel %vm469_vm0, %v536_v53, %v540_v54  ;;  %v564_v13 = vrot.slane %v562_v9, 1  ;;  %v607_v17 = vshrl.u32 %v1255_v10, 16  ;;  %v614_v19 = vshll.u32 %v1256_v15, 16 }
  0x26   : > { %v553_v11 = vsel %vm469_vm0, %v548_v5, %v552_v7  ;;  %v560_v12 = vor.u32 %v559_v8, %v555_v3  ;;  %v611_v18 = vrot.slane %v609_v14, 1 }
  0x27   : > { %572 = vrot.lane.b32.xlu1 %v517_v46, %s1299_s12  ;;  %618 = vrot.lane.b32.xlu0 %v493_v38, %s1300_s13  ;;  %v616_v21 = vrot.slane %v614_v19, 1 }
  0x28   : > { %v565_v16 = vsel %vm469_vm0, %v560_v12, %v564_v13  ;;  %v612_v20 = vor.u32 %v611_v18, %v607_v17 }
  0x2a   : > { %v617_v22 = vsel %vm469_vm0, %v612_v20, %v616_v21 }
  0x2b   : > { %624 = vrot.lane.b32.xlu1 %v529_v52, %s1300_s13  ;;  %570 = vrot.lane.b32.xlu0 %v505_v43, %s1299_s12 }
  0x2f   : > { %576 = vrot.lane.b32.xlu1 %v541_v60, %s1299_s12  ;;  %622 = vrot.lane.b32.xlu0 %v517_v46, %s1300_s13 }
  0x33   : > { %597 = vrot.lane.b32.xlu1 %v1441_v50, %s1298_s10  ;;  %574 = vrot.lane.b32.xlu0 %v529_v52, %s1299_s12 }
  0x37   : > { %628 = vrot.lane.b32.xlu1 %v553_v11, %s1300_s13  ;;  %595 = vrot.lane.b32.xlu0 %v1421_v26, %s1298_s10 }
  0x3b   : > { %580 = vrot.lane.b32.xlu1 %v565_v16, %s1299_s12  ;;  %626 = vrot.lane.b32.xlu0 %v541_v60, %s1300_s13 }
  0x3f   : > { %601 = vrot.lane.b32.xlu1 %v1255_v10, %s1298_s10  ;;  %578 = vrot.lane.b32.xlu0 %v553_v11, %s1299_s12  ;;  %s368_s12 = sadd.s32 %s1127_s11, %s1644_s18 }
  0x40   : > { %s369_s15 = scalar_lea.vmem %s1624_s4, %s368_s12  ;;  %s376_s25 = scalar_lea.vmem %s1625_s5, %s368_s12 }
  0x43   : > { %632 = vrot.lane.b32.xlu1 %v617_v22, %s1300_s13  ;;  %599 = vrot.lane.b32.xlu0 %v1452_v57, %s1298_s10  ;;  %s1530_s10 = scalar_lea.vmem %s1623_s3, %s1126_s7 }
  0x47   : > { %630 = vrot.lane.b32.xlu0 %v565_v16, %s1300_s13 }
  0x89   : > { %v588_v23 = vpop.permute.xlu1 %587  ;;  %v592_v25 = vpop.permute.xlu0 %591 }
  0x8d   : > { %v590_v24 = vpop.permute.xlu1 %589 }
  0x91   : > { %v594_v27 = vpop.permute.xlu1 %593  ;;  %v567_v28 = vpop.permute.xlu0 %566 }
  0x92   : > { %v636_v31 = vsel %vm634_vm1, %v1394_v4, %v567_v28 }
  0x93   : > { %v653_v36 = vsel %vm651_vm2, %v636_v31, %v588_v23 }
  0x95   : > { %v621_v29 = vpop.permute.xlu1 %620  ;;  %v569_v30 = vpop.permute.xlu0 %568 }
  0x96   : > { %v638_v32 = vsel %vm634_vm1, %v1379_v0, %v569_v30 }
  0x97   : > { %v655_v33 = vsel %vm651_vm2, %v638_v32, %v590_v24 }
  0x98   : > { %v672_v38 = vsel %vm668_vm3, %v655_v33, %v621_v29 }
  0x99   : > { %v573_v34 = vpop.permute.xlu1 %572  ;;  %v619_v35 = vpop.permute.xlu0 %618 }
  0x9a   : > { %v670_v37 = vsel %vm668_vm3, %v653_v36, %v619_v35  ;;  %v642_v40 = vsel %vm634_vm1, %v1382_v1, %v573_v34 }
  0x9b   : > { %1175 = vmatprep.mubr.msk.bf16.mxu0 %vm693_vm4, %v670_v37  ;;  %v659_v44 = vsel %vm651_vm2, %v642_v40, %v594_v27 }
  0x9c   : > { %1176 = vmatmul.mubr.msk.bf16.vlgmr.msra.gmra.mxu0 %vm693_vm4, %v672_v38 }
  0x9d   : > { %v625_v4 = vpop.permute.xlu1 %624  ;;  %v571_v39 = vpop.permute.xlu0 %570 }
  0x9e   : > { %v640_v0 = vsel %vm634_vm1, %v1388_v2, %v571_v39  ;;  %v676_v46 = vsel %vm668_vm3, %v659_v44, %v625_v4 }
  0x9f   : > { %v657_v42 = vsel %vm651_vm2, %v640_v0, %v592_v25 }
  0xa1   : > { %v577_v41 = vpop.permute.xlu1 %576  ;;  %v623_v43 = vpop.permute.xlu0 %622 }
  0xa2   : > { %v674_v45 = vsel %vm668_vm3, %v657_v42, %v623_v43  ;;  %v646_v1 = vsel %vm634_vm1, %v1421_v26, %v577_v41 }
  0xa3   : > { %1179 = vmatprep.mubr.msk.bf16.mxu0 %vm693_vm4, %v674_v45 }
  0xa4   : > { %1180 = vmatmul.mubr.msk.bf16.gmra.mxu0 %vm693_vm4, %v676_v46 }
  0xa5   : > { %v598_v47 = vpop.permute.xlu1 %597  ;;  %v575_v48 = vpop.permute.xlu0 %574 }
  0xa6   : > { %v644_v51 = vsel %vm634_vm1, %v1398_v6, %v575_v48  ;;  %v663_v55 = vsel %vm651_vm2, %v646_v1, %v598_v47 }
  0xa9   : > { %v629_v2 = vpop.permute.xlu1 %628  ;;  %v596_v49 = vpop.permute.xlu0 %595 }
  0xaa   : > { %v661_v53 = vsel %vm651_vm2, %v644_v51, %v596_v49  ;;  %v680_v58 = vsel %vm668_vm3, %v663_v55, %v629_v2 }
  0xad   : > { %v581_v52 = vpop.permute.xlu1 %580  ;;  %v627_v54 = vpop.permute.xlu0 %626 }
  0xae   : > { %v678_v56 = vsel %vm668_vm3, %v661_v53, %v627_v54  ;;  %v650_v6 = vsel %vm634_vm1, %v1452_v57, %v581_v52 }
  0xaf   : > { %1183 = vmatprep.mubr.msk.bf16.mxu1 %vm693_vm4, %v678_v56 }
  0xb0   : > { %1184 = vmatmul.mubr.msk.bf16.vlgmr.msra.gmra.mxu1 %vm693_vm4, %v680_v58 }
  0xb1   : > { %v579_v59 = vpop.permute.xlu0 %578  ;;  %v602_v26 = vpop.permute.xlu1 %601 }
  0xb2   : > { %v648_v61 = vsel %vm634_vm1, %v1441_v50, %v579_v59  ;;  %v667_v5 = vsel %vm651_vm2, %v650_v6, %v602_v26 }
  0xb5   : > { %v600_v60 = vpop.permute.xlu0 %599  ;;  %v633_v62 = vpop.permute.xlu1 %632 }
  0xb6   : > { %v665_v63 = vsel %vm651_vm2, %v648_v61, %v600_v60  ;;  %v684_v8 = vsel %vm668_vm3, %v667_v5, %v633_v62 }
  0xb9   : > { %v631_v3 = vpop.permute.xlu0 %630 }
  0xba   : > { %v682_v7 = vsel %vm668_vm3, %v665_v63, %v631_v3 }
  0xbb   : > { %1187 = vmatprep.mubr.msk.bf16.mxu1 %vm693_vm4, %v682_v7 }
  0xbc   : > { %1188 = vmatmul.mubr.msk.bf16.gmra.mxu1 %vm693_vm4, %v684_v8 }
 0x15c   : > { %v1177_v50 = vpop.f32.mrf.mxu0 }
 0x15d   : > { %810 = vst.msk [vmem:[%s1530_s10 + $0x10] sm:$0xff] %vm807_vm5, %v1177_v50  ;;  %v865_v12 = vmul.f32 %v1177_v50, %v1177_v50  ;;  %v827_v18 = vsel %vm807_vm5, %v1177_v50, 0.0 }
 0x15e   : > { %v744_v57 = vpop.f32.mrf.mxu0 }
 0x15f   : > { %808 = vst.msk [vmem:[%s1530_s10] sm:$0xff] %vm807_vm5, %v744_v57  ;;  %v863_v10 = vmul.f32 %v744_v57, %v744_v57  ;;  %v824_v13 = vsel %vm807_vm5, %v744_v57, 0.0  ;;  %v882_v25 = vsel %vm807_vm5, %v865_v12, 0.0 }
 0x160   : > { %v1178_v9 = vpop.f32.mrf.mxu0 }
 0x161   : > { %811 = vst.msk [vmem:[%s1530_s10 + $0x18] sm:$0xff] %vm807_vm5, %v1178_v9  ;;  %v879_v19 = vsel %vm807_vm5, %v863_v10, 0.0  ;;  %v866_v20 = vmul.f32 %v1178_v9, %v1178_v9  ;;  %v829_v27 = vsel %vm807_vm5, %v1178_v9, 0.0 }
 0x162   : > { %v747_v11 = vpop.f32.mrf.mxu0 }
 0x163   : > { %809 = vst.msk [vmem:[%s1530_s10 + $0x8] sm:$0xff] %vm807_vm5, %v747_v11  ;;  %v825_v14 = vsel %vm807_vm5, %v747_v11, 0.0  ;;  %v864_v15 = vmul.f32 %v747_v11, %v747_v11  ;;  %v884_v32 = vsel %vm807_vm5, %v866_v20, 0.0 }
 0x164   : > { %v826_v16 = vadd.f32 %v825_v14, %v824_v13  ;;  %v1181_v17 = vpop.f32.mrf.mxu0 }
 0x165   : > { %v880_v21 = vsel %vm807_vm5, %v864_v15, 0.0  ;;  %814 = vst.msk [vmem:[%s1530_s10 + $0x30] sm:$0xff] %vm807_vm5, %v1181_v17  ;;  %v869_v40 = vmul.f32 %v1181_v17, %v1181_v17  ;;  %v835_v43 = vsel %vm807_vm5, %v1181_v17, 0.0 }
 0x166   : > { %v828_v22 = vadd.f32 %v827_v18, %v826_v16  ;;  %v881_v23 = vadd.f32 %v880_v21, %v879_v19  ;;  %v760_v24 = vpop.f32.mrf.mxu0 }
 0x167   : > { %812 = vst.msk [vmem:[%s1530_s10 + $0x20] sm:$0xff] %vm807_vm5, %v760_v24  ;;  %v867_v28 = vmul.f32 %v760_v24, %v760_v24  ;;  %v831_v33 = vsel %vm807_vm5, %v760_v24, 0.0  ;;  %v890_v46 = vsel %vm807_vm5, %v869_v40, 0.0 }
 0x168   : > { %v883_v29 = vadd.f32 %v882_v25, %v881_v23  ;;  %v830_v30 = vadd.f32 %v829_v27, %v828_v22  ;;  %v1182_v31 = vpop.f32.mrf.mxu0 }
 0x169   : > { %815 = vst.msk [vmem:[%s1530_s10 + $0x38] sm:$0xff] %vm807_vm5, %v1182_v31  ;;  %v886_v37 = vsel %vm807_vm5, %v867_v28, 0.0  ;;  %v870_v47 = vmul.f32 %v1182_v31, %v1182_v31  ;;  %v837_v49 = vsel %vm807_vm5, %v1182_v31, 0.0 }
 0x16a   : > { %v832_v34 = vadd.f32 %v831_v33, %v830_v30  ;;  %v885_v35 = vadd.f32 %v884_v32, %v883_v29  ;;  %v763_v36 = vpop.f32.mrf.mxu0 }
 0x16b   : > { %813 = vst.msk [vmem:[%s1530_s10 + $0x28] sm:$0xff] %vm807_vm5, %v763_v36  ;;  %v833_v38 = vsel %vm807_vm5, %v763_v36, 0.0  ;;  %v868_v4 = vmul.f32 %v763_v36, %v763_v36  ;;  %v892_v54 = vsel %vm807_vm5, %v870_v47, 0.0 }
 0x16c   : > { %v887_v39 = vadd.f32 %v886_v37, %v885_v35  ;;  %v834_v0 = vadd.f32 %v833_v38, %v832_v34 }
 0x16d   : > { %v888_v41 = vsel %vm807_vm5, %v868_v4, 0.0 }
 0x16e   : > { %v889_v42 = vadd.f32 %v888_v41, %v887_v39  ;;  %v836_v44 = vadd.f32 %v835_v43, %v834_v0 }
 0x170   : > { %v1185_v45 = vpop.f32.mrf.mxu1  ;;  %v891_v48 = vadd.f32 %v890_v46, %v889_v42  ;;  %v838_v52 = vadd.f32 %v837_v49, %v836_v44 }
 0x171   : > { %818 = vst.msk [vmem:[%s1530_s10 + $0x50] sm:$0xff] %vm807_vm5, %v1185_v45  ;;  %v873_v62 = vmul.f32 %v1185_v45, %v1185_v45  ;;  %v843_v5 = vsel %vm807_vm5, %v1185_v45, 0.0 }
 0x172   : > { %v776_v2 = vpop.f32.mrf.mxu1  ;;  %v893_v58 = vadd.f32 %v892_v54, %v891_v48 }
 0x173   : > { %816 = vst.msk [vmem:[%s1530_s10 + $0x40] sm:$0xff] %vm807_vm5, %v776_v2  ;;  %v839_v1 = vsel %vm807_vm5, %v776_v2, 0.0  ;;  %v871_v51 = vmul.f32 %v776_v2, %v776_v2  ;;  %v898_v50 = vsel %vm807_vm5, %v873_v62, 0.0 }
 0x174   : > { %v1186_v53 = vpop.f32.mrf.mxu1  ;;  %v840_v56 = vadd.f32 %v839_v1, %v838_v52 }
 0x175   : > { %v894_v55 = vsel %vm807_vm5, %v871_v51, 0.0  ;;  %819 = vst.msk [vmem:[%s1530_s10 + $0x58] sm:$0xff] %vm807_vm5, %v1186_v53  ;;  %v874_v57 = vmul.f32 %v1186_v53, %v1186_v53  ;;  %v845_v11 = vsel %vm807_vm5, %v1186_v53, 0.0 }
 0x176   : > { %v779_v59 = vpop.f32.mrf.mxu1  ;;  %v895_v6 = vadd.f32 %v894_v55, %v893_v58 }
 0x177   : > { %817 = vst.msk [vmem:[%s1530_s10 + $0x48] sm:$0xff] %vm807_vm5, %v779_v59  ;;  %v841_v26 = vsel %vm807_vm5, %v779_v59, 0.0  ;;  %v872_v60 = vmul.f32 %v779_v59, %v779_v59  ;;  %v900_v16 = vsel %vm807_vm5, %v874_v57, 0.0 }
 0x178   : > { %v842_v61 = vadd.f32 %v841_v26, %v840_v56 }
 0x179   : > { %v896_v63 = vsel %vm807_vm5, %v872_v60, 0.0 }
 0x17a   : > { %v897_v3 = vadd.f32 %v896_v63, %v895_v6  ;;  %v844_v7 = vadd.f32 %v843_v5, %v842_v61 }
 0x17c   : > { %v1189_v8 = vpop.f32.mrf.mxu1  ;;  %v899_v9 = vadd.f32 %v898_v50, %v897_v3  ;;  %v846_v14 = vadd.f32 %v845_v11, %v844_v7 }
 0x17d   : > { %822 = vst.msk [vmem:[%s1530_s10 + $0x70] sm:$0xff] %vm807_vm5, %v1189_v8  ;;  %v877_v21 = vmul.f32 %v1189_v8, %v1189_v8  ;;  %v851_v27 = vsel %vm807_vm5, %v1189_v8, 0.0 }
 0x17e   : > { %v792_v10 = vpop.f32.mrf.mxu1  ;;  %v901_v19 = vadd.f32 %v900_v16, %v899_v9 }
 0x17f   : > { %820 = vst.msk [vmem:[%s1530_s10 + $0x60] sm:$0xff] %vm807_vm5, %v792_v10  ;;  %v847_v12 = vsel %vm807_vm5, %v792_v10, 0.0  ;;  %v875_v13 = vmul.f32 %v792_v10, %v792_v10  ;;  %v906_v32 = vsel %vm807_vm5, %v877_v21, 0.0 }
 0x180   : > { %v1190_v15 = vpop.f32.mrf.mxu1  ;;  %v848_v18 = vadd.f32 %v847_v12, %v846_v14 }
 0x181   : > { %v902_v17 = vsel %vm807_vm5, %v875_v13, 0.0  ;;  %823 = vst.msk [vmem:[%s1530_s10 + $0x78] sm:$0xff] %vm807_vm5, %v1190_v15  ;;  %v878_v28 = vmul.f32 %v1190_v15, %v1190_v15  ;;  %v853_v33 = vsel %vm807_vm5, %v1190_v15, 0.0 }
 0x182   : > { %v795_v20 = vpop.f32.mrf.mxu1  ;;  %v903_v24 = vadd.f32 %v902_v17, %v901_v19 }
 0x183   : > { %821 = vst.msk [vmem:[%s1530_s10 + $0x68] sm:$0xff] %vm807_vm5, %v795_v20  ;;  %v849_v22 = vsel %vm807_vm5, %v795_v20, 0.0  ;;  %v876_v23 = vmul.f32 %v795_v20, %v795_v20  ;;  %v908_v36 = vsel %vm807_vm5, %v878_v28, 0.0 }
 0x184   : > { %v850_v25 = vadd.f32 %v849_v22, %v848_v18 }
 0x185   : > { %v904_v29 = vsel %vm807_vm5, %v876_v23, 0.0 }
 0x186   : > { %v852_v30 = vadd.f32 %v851_v27, %v850_v25  ;;  %v905_v31 = vadd.f32 %v904_v29, %v903_v24 }
 0x188   : > { %v854_v34 = vadd.f32 %v853_v33, %v852_v30  ;;  %v907_v35 = vadd.f32 %v906_v32, %v905_v31 }
 0x18a   : > { %v855_v37 = vrot.slane %v854_v34, 4  ;;  %v909_v38 = vadd.f32 %v908_v36, %v907_v35 }
 0x18c   : > { %v856_v4 = vadd.f32 %v855_v37, %v854_v34  ;;  %v910_v39 = vrot.slane %v909_v38, 4 }
 0x18e   : > { %v857_v0 = vrot.slane %v856_v4, 2  ;;  %v911_v40 = vadd.f32 %v910_v39, %v909_v38 }
 0x190   : > { %v858_v41 = vadd.f32 %v857_v0, %v856_v4  ;;  %v912_v42 = vrot.slane %v911_v40, 2 }
 0x192   : > { %v859_v43 = vrot.slane %v858_v41, 1  ;;  %v913_v44 = vadd.f32 %v912_v42, %v911_v40 }
 0x194   : > { %v860_v45 = vadd.f32 %v859_v43, %v858_v41  ;;  %v914_v46 = vrot.slane %v913_v44, 1 }
 0x196   : > { %862 = vst.msk [vmem:[%s369_s15] sm:$0x1] %vm861_vm6, %v860_v45  ;;  %v915_v47 = vadd.f32 %v914_v46, %v913_v44 }
 0x198   : > { %916 = vst.msk [vmem:[%s376_s25] sm:$0x1] %vm861_vm6, %v915_v47 }
 0x199 PF: > { %s16_s22 = sadd.s32 1, %s1296_s22   ;;  %s1627_s18 = smov %s1288_s20 }
 0x19a   : > { %p13_p10 = scmp.ge.s32.totalorder %s16_s22, 6   ;;  %s1628_s19 = smov %s1292_s21 }
 0x19b   : > { %s1629_s20 = smov %s1632_s23  ;;  %s1630_s21 = smov %s1636_s24 }
 0x19c   :  { %15 = sbr.rel (!%p13_p10) target bundleno = 3 (0x3), region = 89 }

</bundles_post_ra>
